<compile_context>
chip_gen: v7x
topology: tpu7x:2x2x1
jax: 0.10.0
libtpu: 0.0.40
codegen_flags: <defaults>
</compile_context>

<pallas_src>
import jax
import jax.numpy as jnp
from jax.experimental import pallas as pl
from jax.experimental.pallas import tpu as pltpu


def _round_up(x, m):
    return (x + m - 1) // m * m


def _vmem_capacity_bytes():
    """Per-generation VMEM capacity; conservative fallback if unavailable."""
    try:
        cap = int(getattr(pltpu.get_tpu_info(), "vmem_capacity_bytes", 0))
        if cap > 0:
            return cap
    except Exception:
        pass
    return 64 << 20  # v7x-sized lower bound (v5e/v6e have 128 MiB)


def _make_kernel(*, Gb, KH, KW, s, Wq, Lo_pad, Cin_g):
    """Fused-im2col conv kernel.

    Ref shapes (per grid step):
      x_ref: (1, Gb, s*s, Cin_g, L_pad)  phase-split, HW-flattened input slab
      w_ref: (Gb, KH*KW, Cout_g, Cin_g)  per-tap weight matrices
      b_ref: (Gb, Cout_g, 1)             f32 bias
      o_ref: (1, Gb, Cout_g, Lo_pad)     lane-dense output slab (pitch Wq)
    """
    def kernel(x_ref, w_ref, b_ref, o_ref):
        for g in range(Gb):                      # packed groups (static unroll)
            acc = None
            for kh in range(KH):
                for kw in range(KW):
                    p = (kh % s) * s + (kw % s)              # stride phase
                    off = (kh // s) * Wq + (kw // s)         # tap offset (static)
                    rhs = x_ref[0, g, p, :, off:off + Lo_pad]   # (Cin_g, Lo_pad)
                    w_t = w_ref[g, kh * KW + kw]                # (Cout_g, Cin_g)
                    if Cin_g == 1:
                        # Depthwise-style: VPU broadcast multiply, skip the MXU.
                        part = w_t.astype(jnp.float32) * rhs.astype(jnp.float32)
                    else:
                        part = jnp.dot(w_t, rhs,
                                       preferred_element_type=jnp.float32)
                    acc = part if acc is None else acc + part
            acc = acc + b_ref[g]                             # (Cout_g, 1) bcast
            o_ref[0, g] = acc.astype(o_ref.dtype)
    return kernel


def conv2d_pallas(x_nchw, weight_oihw, bias, *, stride=1, groups=1,
                  compute_dtype=None):
    """nn.Conv2d(in, out, k, stride, padding=k//2, groups) forward.

    x_nchw:      (N, Cin, H, W)
    weight_oihw: (Cout, Cin//groups, KH, KW)   (PyTorch layout)
    bias:        (Cout,)
    compute_dtype: optional MXU compute dtype (e.g. jnp.bfloat16); accumulation
                   is always f32 and the output keeps x_nchw.dtype.
    returns      (N, Cout, Ho, Wo)
    """
    N, Cin, H, W = x_nchw.shape
    Cout, Cin_g, KH, KW = weight_oihw.shape
    assert Cin_g * groups == Cin and Cout % groups == 0
    Cout_g = Cout // groups
    s = int(stride)
    pad_h, pad_w = KH // 2, KW // 2          # nn.Conv2d(padding=kernel_size//2)

    Hp, Wp = H + 2 * pad_h, W + 2 * pad_w
    Ho = (Hp - KH) // s + 1
    Wo = (Wp - KW) // s + 1

    # Stride phase decomposition (space-to-depth): every tap becomes a
    # unit-stride slice of one of the s*s phase slabs.
    Hq, Wq = -(-Hp // s), -(-Wp // s)
    Hp2, Wp2 = Hq * s, Wq * s
    P2 = s * s
    T = KH * KW
    oh_max, ow_max = (KH - 1) // s, (KW - 1) // s

    # Output is computed with row pitch Wq (junk columns discarded afterwards)
    # so that a tap is one contiguous lane slice; pad widths to 128 for
    # lane-dense (unmasked) loads/stores.
    Lo = Ho * Wq
    Lo_pad = _round_up(Lo, 128)
    L_pad = _round_up(max(Hq * Wq, oh_max * Wq + ow_max + Lo_pad), 128)

    cdtype = jnp.dtype(compute_dtype) if compute_dtype is not None \
        else jnp.dtype(x_nchw.dtype)
    csize = cdtype.itemsize
    osize = jnp.dtype(x_nchw.dtype).itemsize

    # ---- wrapper layout glue (≈1x input traffic, no KH*KW expansion) -------
    x_pad = jnp.pad(x_nchw, ((0, 0), (0, 0),
                             (pad_h, pad_h + Hp2 - Hp),
                             (pad_w, pad_w + Wp2 - Wp)))
    x_ph = x_pad.reshape(N, groups, Cin_g, Hq, s, Wq, s)
    x_ph = jnp.transpose(x_ph, (0, 1, 4, 6, 2, 3, 5))   # (N,g,sh,sw,Cin_g,Hq,Wq)
    x_ph = x_ph.reshape(N, groups, P2, Cin_g, Hq * Wq)
    x_ph = jnp.pad(x_ph, ((0, 0),) * 4 + ((0, L_pad - Hq * Wq),)).astype(cdtype)

    w = weight_oihw.reshape(groups, Cout_g, Cin_g, KH, KW)
    w = jnp.transpose(w, (0, 3, 4, 1, 2)).reshape(groups, T, Cout_g, Cin_g)
    w = w.astype(cdtype)
    b = bias.astype(jnp.float32).reshape(groups, Cout_g, 1)

    # ---- VMEM-aware choice of groups-per-step (Gb) and scoped VMEM limit ---
    per_group = (P2 * Cin_g * L_pad) * csize \
        + T * Cout_g * Cin_g * csize \
        + Cout_g * 4 \
        + Cout_g * Lo_pad * osize \
        + Cout_g * Lo_pad * 4                 # f32 accumulator values
    vmem_cap = _vmem_capacity_bytes()
    budget = int(0.25 * vmem_cap)             # leave room for double buffering
    max_gb = max(1, min(8, 128 // max(T, 1)))  # bound kernel unrolling
    Gb = 1
    for cand in range(1, min(groups, max_gb) + 1):
        if groups % cand == 0 and cand * per_group <= budget:
            Gb = cand
    step_bytes = 2 * Gb * ((P2 * Cin_g * L_pad) * csize
                           + T * Cout_g * Cin_g * csize
                           + Cout_g * 4
                           + Cout_g * Lo_pad * osize) \
        + Gb * Cout_g * Lo_pad * 4
    vmem_limit = int(min(0.85 * vmem_cap, max(32 << 20, 2 * step_bytes)))

    kernel = _make_kernel(Gb=Gb, KH=KH, KW=KW, s=s, Wq=Wq,
                          Lo_pad=Lo_pad, Cin_g=Cin_g)

    cost = pl.CostEstimate(
        flops=2 * N * Cout * Cin_g * T * Ho * Wo,
        transcendentals=0,
        bytes_accessed=int(x_ph.size * csize + w.size * csize + b.size * 4
                           + N * Cout * Lo_pad * osize),
    )

    # Grid: (group blocks, batch).  Batch is the innermost axis and the
    # weight/bias index_maps are constant in it, so weights stay DMA-resident
    # across the whole batch for each group block.
    out = pl.pallas_call(
        kernel,
        out_shape=jax.ShapeDtypeStruct((N, groups, Cout_g, Lo_pad),
                                       x_nchw.dtype),
        grid_spec=pltpu.PrefetchScalarGridSpec(
            num_scalar_prefetch=0,
            grid=(groups // Gb, N),
            in_specs=[
                pl.BlockSpec((1, Gb, P2, Cin_g, L_pad),
                             lambda gb, n: (n, gb, 0, 0, 0)),
                pl.BlockSpec((Gb, T, Cout_g, Cin_g),
                             lambda gb, n: (gb, 0, 0, 0)),
                pl.BlockSpec((Gb, Cout_g, 1),
                             lambda gb, n: (gb, 0, 0)),
            ],
            out_specs=pl.BlockSpec((1, Gb, Cout_g, Lo_pad),
                                   lambda gb, n: (n, gb, 0, 0)),
        ),
        compiler_params=pltpu.CompilerParams(
            dimension_semantics=("parallel", "parallel"),
            vmem_limit_bytes=vmem_limit),
        cost_estimate=cost,
    )(x_ph, w, b)

    # (N, groups, Cout_g, Lo_pad) -> drop pitch-padding junk -> NCHW.
    out = out[..., :Ho * Wq].reshape(N, groups, Cout_g, Ho, Wq)[..., :Wo]
    return out.reshape(N, Cout, Ho, Wo)


if __name__ == "__main__":
    key = jax.random.PRNGKey(0)

    def run_case(case_key, *, in_c, out_c, k, stride, groups,
                 compute_dtype=None, atol=2e-2, rtol=2e-2):
        kx, kw_, kb_ = jax.random.split(case_key, 3)
        x = jax.random.normal(kx, (2, in_c, 16, 16), dtype=jnp.float32)
        fan_in = (in_c // groups) * k * k
        bound = 1.0 / (fan_in ** 0.5)
        w = jax.random.uniform(kw_, (out_c, in_c // groups, k, k),
                               dtype=jnp.float32, minval=-bound, maxval=bound)
        b = jax.random.uniform(kb_, (out_c,), dtype=jnp.float32,
                               minval=-bound, maxval=bound)

        out = conv2d_pallas(x, w, b, stride=stride, groups=groups,
                            compute_dtype=compute_dtype)
        out = jax.block_until_ready(out)

        ref = jax.lax.conv_general_dilated(
            x, w, (stride, stride), [(k // 2, k // 2)] * 2,
            dimension_numbers=("NCHW", "OIHW", "NCHW"),
            feature_group_count=groups,
            precision=jax.lax.Precision.HIGHEST) + b.reshape(1, -1, 1, 1)

        assert out.shape == ref.shape, (out.shape, ref.shape)
        # Tolerance covers the MXU's bf16-pass arithmetic for f32 inputs.
        assert bool(jnp.allclose(out, ref, atol=atol, rtol=rtol)), \
            float(jnp.max(jnp.abs(out - ref)))

    # Benchmark config: ConvNet(4, 8, kernel_size=3, stride=1, groups=1, f32),
    # x: (2, 4, 16, 16) NCHW.
    run_case(jax.random.fold_in(key, 0), in_c=4, out_c=8, k=3, stride=1, groups=1)
    # Strided conv (exercises the stride phase decomposition path).
    run_case(jax.random.fold_in(key, 1), in_c=4, out_c=8, k=3, stride=2, groups=1)
    # Grouped conv (exercises group packing + the depthwise/VPU path, Cin_g=1).
    run_case(jax.random.fold_in(key, 2), in_c=4, out_c=8, k=3, stride=1, groups=4)
    # bf16 MXU compute path (f32 accumulation), looser tolerance.
    run_case(jax.random.fold_in(key, 3), in_c=4, out_c=8, k=3, stride=1, groups=1,
             compute_dtype=jnp.bfloat16, atol=5e-2, rtol=5e-2)

    print("KERNEL_OK")
</pallas_src>

<mosaic_0001>
module attributes {stable_mosaic.version = 11 : i64} {
  func.func @kernel(%arg0: i32, %arg1: i32, %arg2: memref<1x1x1x4x512xf32, #tpu.memory_space<vmem>>, %arg3: memref<1x9x8x4xf32, #tpu.memory_space<vmem>>, %arg4: memref<1x8x1xf32, #tpu.memory_space<vmem>>, %arg5: memref<1x1x8x384xf32, #tpu.memory_space<vmem>>) attributes {dimension_semantics = [#tpu.dimension_semantics<parallel>, #tpu.dimension_semantics<parallel>], iteration_bounds = array<i64: 1, 2>, scalar_prefetch = 0 : i64, scratch_operands = 0 : i64, tpu.core_type = #tpu.core_type<tc>, window_params = [{transform_indices = @transform_0, window_bounds = array<i64: 1, 1, 1, 4, 512>}, {transform_indices = @transform_1, window_bounds = array<i64: 1, 9, 8, 4>}, {transform_indices = @transform_2, window_bounds = array<i64: 1, 8, 1>}, {transform_indices = @transform_3, window_bounds = array<i64: 1, 1, 8, 384>}]} {
    %c0 = arith.constant 0 : index
    %c0_0 = arith.constant 0 : index
    %c0_1 = arith.constant 0 : index
    %c0_2 = arith.constant 0 : index
    %c0_3 = arith.constant 0 : index
    %0 = vector.load %arg2[%c0, %c0_0, %c0_1, %c0_2, %c0_3] : memref<1x1x1x4x512xf32, #tpu.memory_space<vmem>>, vector<1x1x1x4x384xf32>
    %1 = vector.shape_cast %0 : vector<1x1x1x4x384xf32> to vector<4x384xf32>
    %c0_4 = arith.constant 0 : index
    %c0_5 = arith.constant 0 : index
    %c0_6 = arith.constant 0 : index
    %c0_7 = arith.constant 0 : index
    %2 = vector.load %arg3[%c0_4, %c0_5, %c0_6, %c0_7] : memref<1x9x8x4xf32, #tpu.memory_space<vmem>>, vector<1x1x8x4xf32>
    %3 = vector.shape_cast %2 : vector<1x1x8x4xf32> to vector<8x4xf32>
    %cst = arith.constant dense<0.000000e+00> : vector<8x384xf32>
    %4 = tpu.matmul %3, %1, %cst {dimension_numbers = #tpu.dot_dimension_numbers<[1], [0], [0], [1], [0, 0, 1, 1], [], []>} : vector<8x4xf32>, vector<4x384xf32>, vector<8x384xf32> -> vector<8x384xf32>
    %c0_8 = arith.constant 0 : index
    %c0_9 = arith.constant 0 : index
    %c0_10 = arith.constant 0 : index
    %c0_11 = arith.constant 0 : index
    %c1 = arith.constant 1 : index
    %5 = vector.load %arg2[%c0_8, %c0_9, %c0_10, %c0_11, %c1] : memref<1x1x1x4x512xf32, #tpu.memory_space<vmem>>, vector<1x1x1x4x384xf32>
    %6 = vector.shape_cast %5 : vector<1x1x1x4x384xf32> to vector<4x384xf32>
    %c0_12 = arith.constant 0 : index
    %c1_13 = arith.constant 1 : index
    %c0_14 = arith.constant 0 : index
    %c0_15 = arith.constant 0 : index
    %7 = vector.load %arg3[%c0_12, %c1_13, %c0_14, %c0_15] : memref<1x9x8x4xf32, #tpu.memory_space<vmem>>, vector<1x1x8x4xf32>
    %8 = vector.shape_cast %7 : vector<1x1x8x4xf32> to vector<8x4xf32>
    %cst_16 = arith.constant dense<0.000000e+00> : vector<8x384xf32>
    %9 = tpu.matmul %8, %6, %cst_16 {dimension_numbers = #tpu.dot_dimension_numbers<[1], [0], [0], [1], [0, 0, 1, 1], [], []>} : vector<8x4xf32>, vector<4x384xf32>, vector<8x384xf32> -> vector<8x384xf32>
    %10 = arith.addf %4, %9 : vector<8x384xf32>
    %c0_17 = arith.constant 0 : index
    %c0_18 = arith.constant 0 : index
    %c0_19 = arith.constant 0 : index
    %c0_20 = arith.constant 0 : index
    %c2 = arith.constant 2 : index
    %11 = vector.load %arg2[%c0_17, %c0_18, %c0_19, %c0_20, %c2] : memref<1x1x1x4x512xf32, #tpu.memory_space<vmem>>, vector<1x1x1x4x384xf32>
    %12 = vector.shape_cast %11 : vector<1x1x1x4x384xf32> to vector<4x384xf32>
    %c0_21 = arith.constant 0 : index
    %c2_22 = arith.constant 2 : index
    %c0_23 = arith.constant 0 : index
    %c0_24 = arith.constant 0 : index
    %13 = vector.load %arg3[%c0_21, %c2_22, %c0_23, %c0_24] : memref<1x9x8x4xf32, #tpu.memory_space<vmem>>, vector<1x1x8x4xf32>
    %14 = vector.shape_cast %13 : vector<1x1x8x4xf32> to vector<8x4xf32>
    %cst_25 = arith.constant dense<0.000000e+00> : vector<8x384xf32>
    %15 = tpu.matmul %14, %12, %cst_25 {dimension_numbers = #tpu.dot_dimension_numbers<[1], [0], [0], [1], [0, 0, 1, 1], [], []>} : vector<8x4xf32>, vector<4x384xf32>, vector<8x384xf32> -> vector<8x384xf32>
    %16 = arith.addf %10, %15 : vector<8x384xf32>
    %c0_26 = arith.constant 0 : index
    %c0_27 = arith.constant 0 : index
    %c0_28 = arith.constant 0 : index
    %c0_29 = arith.constant 0 : index
    %c18 = arith.constant 18 : index
    %17 = vector.load %arg2[%c0_26, %c0_27, %c0_28, %c0_29, %c18] : memref<1x1x1x4x512xf32, #tpu.memory_space<vmem>>, vector<1x1x1x4x384xf32>
    %18 = vector.shape_cast %17 : vector<1x1x1x4x384xf32> to vector<4x384xf32>
    %c0_30 = arith.constant 0 : index
    %c3 = arith.constant 3 : index
    %c0_31 = arith.constant 0 : index
    %c0_32 = arith.constant 0 : index
    %19 = vector.load %arg3[%c0_30, %c3, %c0_31, %c0_32] : memref<1x9x8x4xf32, #tpu.memory_space<vmem>>, vector<1x1x8x4xf32>
    %20 = vector.shape_cast %19 : vector<1x1x8x4xf32> to vector<8x4xf32>
    %cst_33 = arith.constant dense<0.000000e+00> : vector<8x384xf32>
    %21 = tpu.matmul %20, %18, %cst_33 {dimension_numbers = #tpu.dot_dimension_numbers<[1], [0], [0], [1], [0, 0, 1, 1], [], []>} : vector<8x4xf32>, vector<4x384xf32>, vector<8x384xf32> -> vector<8x384xf32>
    %22 = arith.addf %16, %21 : vector<8x384xf32>
    %c0_34 = arith.constant 0 : index
    %c0_35 = arith.constant 0 : index
    %c0_36 = arith.constant 0 : index
    %c0_37 = arith.constant 0 : index
    %c19 = arith.constant 19 : index
    %23 = vector.load %arg2[%c0_34, %c0_35, %c0_36, %c0_37, %c19] : memref<1x1x1x4x512xf32, #tpu.memory_space<vmem>>, vector<1x1x1x4x384xf32>
    %24 = vector.shape_cast %23 : vector<1x1x1x4x384xf32> to vector<4x384xf32>
    %c0_38 = arith.constant 0 : index
    %c4 = arith.constant 4 : index
    %c0_39 = arith.constant 0 : index
    %c0_40 = arith.constant 0 : index
    %25 = vector.load %arg3[%c0_38, %c4, %c0_39, %c0_40] : memref<1x9x8x4xf32, #tpu.memory_space<vmem>>, vector<1x1x8x4xf32>
    %26 = vector.shape_cast %25 : vector<1x1x8x4xf32> to vector<8x4xf32>
    %cst_41 = arith.constant dense<0.000000e+00> : vector<8x384xf32>
    %27 = tpu.matmul %26, %24, %cst_41 {dimension_numbers = #tpu.dot_dimension_numbers<[1], [0], [0], [1], [0, 0, 1, 1], [], []>} : vector<8x4xf32>, vector<4x384xf32>, vector<8x384xf32> -> vector<8x384xf32>
    %28 = arith.addf %22, %27 : vector<8x384xf32>
    %c0_42 = arith.constant 0 : index
    %c0_43 = arith.constant 0 : index
    %c0_44 = arith.constant 0 : index
    %c0_45 = arith.constant 0 : index
    %c20 = arith.constant 20 : index
    %29 = vector.load %arg2[%c0_42, %c0_43, %c0_44, %c0_45, %c20] : memref<1x1x1x4x512xf32, #tpu.memory_space<vmem>>, vector<1x1x1x4x384xf32>
    %30 = vector.shape_cast %29 : vector<1x1x1x4x384xf32> to vector<4x384xf32>
    %c0_46 = arith.constant 0 : index
    %c5 = arith.constant 5 : index
    %c0_47 = arith.constant 0 : index
    %c0_48 = arith.constant 0 : index
    %31 = vector.load %arg3[%c0_46, %c5, %c0_47, %c0_48] : memref<1x9x8x4xf32, #tpu.memory_space<vmem>>, vector<1x1x8x4xf32>
    %32 = vector.shape_cast %31 : vector<1x1x8x4xf32> to vector<8x4xf32>
    %cst_49 = arith.constant dense<0.000000e+00> : vector<8x384xf32>
    %33 = tpu.matmul %32, %30, %cst_49 {dimension_numbers = #tpu.dot_dimension_numbers<[1], [0], [0], [1], [0, 0, 1, 1], [], []>} : vector<8x4xf32>, vector<4x384xf32>, vector<8x384xf32> -> vector<8x384xf32>
    %34 = arith.addf %28, %33 : vector<8x384xf32>
    %c0_50 = arith.constant 0 : index
    %c0_51 = arith.constant 0 : index
    %c0_52 = arith.constant 0 : index
    %c0_53 = arith.constant 0 : index
    %c36 = arith.constant 36 : index
    %35 = vector.load %arg2[%c0_50, %c0_51, %c0_52, %c0_53, %c36] : memref<1x1x1x4x512xf32, #tpu.memory_space<vmem>>, vector<1x1x1x4x384xf32>
    %36 = vector.shape_cast %35 : vector<1x1x1x4x384xf32> to vector<4x384xf32>
    %c0_54 = arith.constant 0 : index
    %c6 = arith.constant 6 : index
    %c0_55 = arith.constant 0 : index
    %c0_56 = arith.constant 0 : index
    %37 = vector.load %arg3[%c0_54, %c6, %c0_55, %c0_56] : memref<1x9x8x4xf32, #tpu.memory_space<vmem>>, vector<1x1x8x4xf32>
    %38 = vector.shape_cast %37 : vector<1x1x8x4xf32> to vector<8x4xf32>
    %cst_57 = arith.constant dense<0.000000e+00> : vector<8x384xf32>
    %39 = tpu.matmul %38, %36, %cst_57 {dimension_numbers = #tpu.dot_dimension_numbers<[1], [0], [0], [1], [0, 0, 1, 1], [], []>} : vector<8x4xf32>, vector<4x384xf32>, vector<8x384xf32> -> vector<8x384xf32>
    %40 = arith.addf %34, %39 : vector<8x384xf32>
    %c0_58 = arith.constant 0 : index
    %c0_59 = arith.constant 0 : index
    %c0_60 = arith.constant 0 : index
    %c0_61 = arith.constant 0 : index
    %c37 = arith.constant 37 : index
    %41 = vector.load %arg2[%c0_58, %c0_59, %c0_60, %c0_61, %c37] : memref<1x1x1x4x512xf32, #tpu.memory_space<vmem>>, vector<1x1x1x4x384xf32>
    %42 = vector.shape_cast %41 : vector<1x1x1x4x384xf32> to vector<4x384xf32>
    %c0_62 = arith.constant 0 : index
    %c7 = arith.constant 7 : index
    %c0_63 = arith.constant 0 : index
    %c0_64 = arith.constant 0 : index
    %43 = vector.load %arg3[%c0_62, %c7, %c0_63, %c0_64] : memref<1x9x8x4xf32, #tpu.memory_space<vmem>>, vector<1x1x8x4xf32>
    %44 = vector.shape_cast %43 : vector<1x1x8x4xf32> to vector<8x4xf32>
    %cst_65 = arith.constant dense<0.000000e+00> : vector<8x384xf32>
    %45 = tpu.matmul %44, %42, %cst_65 {dimension_numbers = #tpu.dot_dimension_numbers<[1], [0], [0], [1], [0, 0, 1, 1], [], []>} : vector<8x4xf32>, vector<4x384xf32>, vector<8x384xf32> -> vector<8x384xf32>
    %46 = arith.addf %40, %45 : vector<8x384xf32>
    %c0_66 = arith.constant 0 : index
    %c0_67 = arith.constant 0 : index
    %c0_68 = arith.constant 0 : index
    %c0_69 = arith.constant 0 : index
    %c38 = arith.constant 38 : index
    %47 = vector.load %arg2[%c0_66, %c0_67, %c0_68, %c0_69, %c38] : memref<1x1x1x4x512xf32, #tpu.memory_space<vmem>>, vector<1x1x1x4x384xf32>
    %48 = vector.shape_cast %47 : vector<1x1x1x4x384xf32> to vector<4x384xf32>
    %c0_70 = arith.constant 0 : index
    %c8 = arith.constant 8 : index
    %c0_71 = arith.constant 0 : index
    %c0_72 = arith.constant 0 : index
    %49 = vector.load %arg3[%c0_70, %c8, %c0_71, %c0_72] : memref<1x9x8x4xf32, #tpu.memory_space<vmem>>, vector<1x1x8x4xf32>
    %50 = vector.shape_cast %49 : vector<1x1x8x4xf32> to vector<8x4xf32>
    %cst_73 = arith.constant dense<0.000000e+00> : vector<8x384xf32>
    %51 = tpu.matmul %50, %48, %cst_73 {dimension_numbers = #tpu.dot_dimension_numbers<[1], [0], [0], [1], [0, 0, 1, 1], [], []>} : vector<8x4xf32>, vector<4x384xf32>, vector<8x384xf32> -> vector<8x384xf32>
    %52 = arith.addf %46, %51 : vector<8x384xf32>
    %c0_74 = arith.constant 0 : index
    %c0_75 = arith.constant 0 : index
    %c0_76 = arith.constant 0 : index
    %53 = vector.load %arg4[%c0_74, %c0_75, %c0_76] : memref<1x8x1xf32, #tpu.memory_space<vmem>>, vector<1x8x1xf32>
    %54 = vector.shape_cast %53 : vector<1x8x1xf32> to vector<8x1xf32>
    %55 = vector.broadcast %54 : vector<8x1xf32> to vector<8x384xf32>
    %56 = arith.addf %52, %55 : vector<8x384xf32>
    %c0_77 = arith.constant 0 : index
    %c0_78 = arith.constant 0 : index
    %c0_79 = arith.constant 0 : index
    %c0_80 = arith.constant 0 : index
    %57 = vector.load %arg5[%c0_77, %c0_78, %c0_79, %c0_80] : memref<1x1x8x384xf32, #tpu.memory_space<vmem>>, vector<1x1x8x384xf32>
    %58 = vector.shape_cast %57 : vector<1x1x8x384xf32> to vector<8x384xf32>
    %59 = vector.shape_cast %56 : vector<8x384xf32> to vector<1x1x8x384xf32>
    tpu.vector_store %arg5[%c0_77, %c0_78, %c0_79, %c0_80], %59 {strides = array<i32>} : memref<1x1x8x384xf32, #tpu.memory_space<vmem>>, vector<1x1x8x384xf32>,
    return
  }
  func.func @transform_0(%arg0: i32, %arg1: i32) -> (i32, i32, i32, i32, i32) {
    %c0_i32 = arith.constant 0 : i32
    %c0_i32_0 = arith.constant 0 : i32
    %c0_i32_1 = arith.constant 0 : i32
    %c0_i32_2 = arith.constant 0 : i32
    return %arg1, %arg0, %c0_i32, %c0_i32_0, %c0_i32_1 : i32, i32, i32, i32, i32
  }
  func.func @transform_1(%arg0: i32, %arg1: i32) -> (i32, i32, i32, i32) {
    %c0_i32 = arith.constant 0 : i32
    %c0_i32_0 = arith.constant 0 : i32
    %c0_i32_1 = arith.constant 0 : i32
    %c0_i32_2 = arith.constant 0 : i32
    return %arg0, %c0_i32, %c0_i32_0, %c0_i32_1 : i32, i32, i32, i32
  }
  func.func @transform_2(%arg0: i32, %arg1: i32) -> (i32, i32, i32) {
    %c0_i32 = arith.constant 0 : i32
    %c0_i32_0 = arith.constant 0 : i32
    %c0_i32_1 = arith.constant 0 : i32
    return %arg0, %c0_i32, %c0_i32_0 : i32, i32, i32
  }
  func.func @transform_3(%arg0: i32, %arg1: i32) -> (i32, i32, i32, i32) {
    %c0_i32 = arith.constant 0 : i32
    %c0_i32_0 = arith.constant 0 : i32
    %c0_i32_1 = arith.constant 0 : i32
    return %arg1, %arg0, %c0_i32, %c0_i32_0 : i32, i32, i32, i32
  }
}

</mosaic_0001>

<bundles_post_ra>
// kernel: tpu_custom_call.1
= control target key start
LH: loop header
LB: loop body
LE: loop exit
PB: predicated region body
PF: predicated region fallthrough
CT: control target
= control target key end

     0   :  { %8 = vsyncpa [#allocation3], 0  ;;  %s2512_s0 = inlined_call_operand.vmem [shape: f32[2,1,1,4,512], index: 0, kind: input, shape index: {}]   ;;  %s2513_s1 = inlined_call_operand.vmem [shape: f32[1,9,8,4], index: 1, kind: input, shape index: {}]   ;;  %s2514_s2 = inlined_call_operand.vmem [shape: f32[1,8,1], index: 2, kind: input, shape index: {}]   ;;  %s2515_s3 = inlined_call_operand.hbm [shape: f32[2,1,8,384], index: 3, kind: output, shape index: {}]  }
   0x1   :  { %10 = vsyncpa [#allocation3 + $0x1], 0  ;;  %s2239_s12 = smov 0   ;;  %s2241_s13 = smov 0  }
   0x2   :  { %s2243_s14 = smov 0   ;;  %s2245_s15 = smov 0  }
   0x3   :  { %s2247_s16 = smov 0   ;;  %s2249_s17 = smov 0  }
   0x4 LB: > { %s1911_s18 = sadd.s32 4294967295, %s2205_s17   ;;  %s1912_s19 = sadd.s32 4294967294, %s2205_s17   ;;  %s2205_s17 = sphi %s2249_s17, %s16_s17   ;;  %s2201_s16 = sphi %s2247_s16, %s2522_s16   ;;  %s2197_s15 = sphi %s2245_s15, %s2521_s15   ;;  %s2193_s14 = sphi %s2243_s14, %s2520_s14   ;;  %s2189_s13 = sphi %s2241_s13, %s2519_s13   ;;  %s2185_s12 = sphi %s2239_s12, %s2518_s12  }
   0x5   : > { %s25_s20 = sadd.s32 1, %s2201_s16  ;;  %s117_s21 = sadd.s32 1, %s2193_s14 }
   0x6   : > { %p26_p0 = scmp.ge.s32.totalorder %s25_s20, 2  ;;  %p127_p1 = scmp.ne.s32.totalorder %s2193_s14, %s2189_s13 }
   0x7   : > { %p128_p2 = scmp.eq.s32.totalorder %s1911_s18, 1  ;;  %p133_p3 = scmp.ne.s32.totalorder %s2189_s13, %s2185_s12 }
   0x8   : > { %s2524_s20 = smov (%p26_p0, %s25_s20), 0  ;;  %p134_p5 = scmp.eq.s32.totalorder %s1912_s19, 1 }
   0x9   : > { %p2279_p4 = por %p128_p2, %p127_p1  ;;  %s112_s23 = ssub.s32 %s2201_s16, %s2524_s20 }
   0xa   : > { %p1917_p6 = scmp.ge.s32.totalorder %s2205_s17, 1  ;;  %p115_p7 = scmp.eq.s32.totalorder %s112_s23, 0 }
   0xb   : > { %p2286_p8 = por %p134_p5, %p133_p3  ;;  %p179_p9 = scmp.lt.s32.totalorder %s2205_s17, 3 }
   0xc   : > { %s2292_s25 = scalar_select %p115_p7, %s2193_s14, %s117_s21  }
   0xd   : > { %p180_p10 = pnand %p1917_p6, %p179_p9 }
   0xe   : > { %p216_p11 = scmp.lt.s32.totalorder (!%p180_p10), %s2197_s15, 1  ;;  %v2207_v0 = vmov (!%p180_p10), 0.0   ;;  %s2208_s4 = smov (!%p180_p10), 127   ;;  %vm2210_vm0 = vmmov (!%p180_p10), 0   ;;  %v2217_v5 = vmov (!%p180_p10), 0   ;;  %v1773_v6 = vld [vmem:[%s2514_s2] sm:$0xff] (!%p180_p10) }
   0xf   : > { %183 = sbr.rel (%p180_p10) target bundleno = 444 (0x1bc), region = 32  ;;  %332 = vmatprep.mubr.f32.mxu0 (!%p180_p10), %v2207_v0  ;;  %1995 = vmatprep.subr.mxu1 (!%p180_p10), %v2207_v0  ;;  %s2209_s5 = smov (!%p180_p10), 126   ;;  %vm253_vm1 = vcmask (!%p180_p10), 1039360   ;;  %vm261_vm2 = vcmask (!%p180_p10), 1043456   ;;  %v1920_v12 = vld [vmem:[%s2513_s1 + $0x8] sm:$0xff] (!%p180_p10)  ;;  %vm257_vm3 = vcmask (!%p180_p10), 31744  }
  0x10   : > { %1997 = vmatprep.mubr.msk.f32.mxu1 (!%p180_p10), %vm2210_vm0, %v2207_v0  ;;  %s2211_s6 = smov (!%p180_p10), 110   ;;  %s2212_s7 = smov (!%p180_p10), 109   ;;  %2124 = vset.pattern.permute.xlu0 (!%p180_p10), %v2217_v5  ;;  %vm578_vm4 = vcmask (!%p180_p10), 1031168   ;;  %vm751_vm5 = vcmask (!%p180_p10), 900096   ;;  %v236_v19 = vld [vmem:[%s2513_s1] sm:$0xff] (!%p180_p10)  ;;  %vm924_vm6 = vcmask (!%p180_p10), 891904  }
  0x11   : > { %s2213_s8 = smov (!%p180_p10), 108   ;;  %s2214_s9 = smov (!%p180_p10), 92   ;;  %v1931_v28 = vld [vmem:[%s2513_s1 + $0x10] sm:$0xff] (!%p180_p10)  ;;  %vm1097_vm7 = vcmask (!%p180_p10), 883712   ;;  %v1937_v36 = vld [vmem:[%s2513_s1 + $0x18] sm:$0xff] (!%p180_p10)  ;;  %v1943_v45 = vld [vmem:[%s2513_s1 + $0x20] sm:$0xff] (!%p180_p10) }
  0x12   : > { %s2215_s10 = smov (!%p180_p10), 91   ;;  %s2216_s11 = smov (!%p180_p10), 90   ;;  %vm1270_vm8 = vcmask (!%p180_p10), 752640   ;;  %v1949_v52 = vld [vmem:[%s2513_s1 + $0x28] sm:$0xff] (!%p180_p10)  ;;  %vm1443_vm9 = vcmask (!%p180_p10), 744448   ;;  %v1955_v58 = vld [vmem:[%s2513_s1 + $0x30] sm:$0xff] (!%p180_p10) }
  0x13   : > { %v1961_v63 = vld [vmem:[%s2513_s1 + $0x38] sm:$0xff] (!%p180_p10)  ;;  %vm1616_vm10 = vcmask (!%p180_p10), 736256   ;;  %s213_s23 = sand.u32 (!%p180_p10), 1, %s2189_s13   ;;  %s2057_s28 = smul.u32 (!%p180_p10), 384, %s2197_s15 }
  0x16   : > { %s217_s26 = scalar_select %p216_p11, %s2197_s15, 1 }
  0x17   : > { %s2218_s15 = smov [#allocation2]  }
  0x18   : > { %s1976_s27 = sshll.u32 %s217_s26, 4  ;;  %s2056_s26 = smul.u32 24, %s213_s23 }
  0x19   : > { %s2301_s30 = scalar_lea.vmem %s2512_s0, %s1976_s27 }
  0x1a   : > { %v2304_v1 = vld [vmem:[%s2301_s30] sm:$0xff]  ;;  %v238_v3 = vld [vmem:[%s2301_s30 + $0x8] sm:$0xff]  ;;  %s215_s27 = scalar_lea.vmem [#allocation2], %s2056_s26 }
  0x1b   : > { %245 = vrot.lane.b32.xlu1 %v2304_v1, %s2208_s4  ;;  %v2309_v2 = vcombine.high %v2304_v1, %v2304_v1  ;;  %v244_v4 = vcombine.high %v238_v3, %v238_v3  ;;  %v235_v25 = vld [vmem:[%s2301_s30 + $0x8] sm:$0xf]  ;;  %s1802_s29 = sshll.u32 %s215_s27, 4  ;;  %s2467_s29 = int_to_ptr.vmem [resolvable:$true] %s1802_s29 }
  0x1d   : > { %247 = vrot.lane.b32.xlu0 %v2309_v2, %s2208_s4 }
  0x1f   : > { %570 = vrot.lane.b32.xlu1 %v2304_v1, %s2209_s5 }
  0x21   : > { %249 = vrot.lane.b32.xlu0 %v238_v3, %s2208_s4 }
  0x23   : > { %572 = vrot.lane.b32.xlu1 %v2309_v2, %s2209_s5 }
  0x25   : > { %574 = vrot.lane.b32.xlu0 %v238_v3, %s2209_s5 }
  0x27   : > { %747 = vrot.lane.b32.xlu1 %v238_v3, %s2211_s6 }
  0x29   : > { %745 = vrot.lane.b32.xlu0 %v2309_v2, %s2211_s6 }
  0x2b   : > { %251 = vrot.lane.b32.xlu1 %v244_v4, %s2208_s4 }
  0x2d   : > { %743 = vrot.lane.b32.xlu0 %v2304_v1, %s2211_s6 }
  0x2f   : > { %920 = vrot.lane.b32.xlu1 %v238_v3, %s2212_s7 }
  0x31   : > { %918 = vrot.lane.b32.xlu0 %v2309_v2, %s2212_s7 }
  0x33   : > { %576 = vrot.lane.b32.xlu1 %v244_v4, %s2209_s5  ;;  %s2465_s5 = scalar_lea.hbm %s2515_s3, %s2057_s28 }
  0x35   : > { %916 = vrot.lane.b32.xlu0 %v2304_v1, %s2212_s7 }
  0x37   : > { %1093 = vrot.lane.b32.xlu1 %v238_v3, %s2213_s8 }
  0x39   : > { %1091 = vrot.lane.b32.xlu0 %v2309_v2, %s2213_s8 }
  0x3b   : > { %749 = vrot.lane.b32.xlu1 %v244_v4, %s2211_s6  ;;  %s1786_s6 = scalar_lea.sflag [#allocation3], %s213_s23 }
  0x3d   : > { %1089 = vrot.lane.b32.xlu0 %v2304_v1, %s2213_s8 }
  0x3f   : > { %1264 = vrot.lane.b32.xlu1 %v2309_v2, %s2214_s9 }
  0x41   : > { %922 = vrot.lane.b32.xlu0 %v244_v4, %s2212_s7  ;;  %s2127_s7 = scalar_lea.vmem %s2467_s29, 384 }
  0x42   : > { %p2128_p12 = scmp.ne.s32.totalorder %s2467_s29, %s2127_s7 }
  0x43   : > { %1262 = vrot.lane.b32.xlu1 %v2304_v1, %s2214_s9 }
  0x44   : > { %p2129_p13 = pnand %p2128_p12, %p2279_p4 }
  0x45   : > { %1266 = vrot.lane.b32.xlu0 %v238_v3, %s2214_s9 }
  0x46   : > { %p2130_p0 = pneg %p2129_p13 }
  0x47   : > { %1268 = vrot.lane.b32.xlu1 %v244_v4, %s2214_s9 }
  0x49   : > { %1095 = vrot.lane.b32.xlu0 %v244_v4, %s2213_s8  ;;  %s2131_s8 = sshll.u32 %s2218_s15, 4  ;;  %s2132_s8 = int_to_ptr.vmem [resolvable:$false] %s2131_s8 }
  0x4a   : > { %s2133_s9 = scalar_lea.vmem %s2132_s8, 768  ;;  %p2134_p1 = scmp.lt.s32.totalorder %s2467_s29, %s2132_s8 }
  0x4b   : > { %1439 = vrot.lane.b32.xlu1 %v238_v3, %s2215_s10  ;;  %p2135_p2 = scmp.lt.s32.totalorder %s2133_s9, %s2127_s7 }
  0x4d   : > { %1437 = vrot.lane.b32.xlu0 %v2309_v2, %s2215_s10  ;;  %p2136_p3 = por %p2135_p2, %p2134_p1 }
  0x4f   : > { %1441 = vrot.lane.b32.xlu1 %v244_v4, %s2215_s10  ;;  %p2137_p5 = pnand %p2136_p3, %p2130_p0 }
  0x51   : > { %1435 = vrot.lane.b32.xlu0 %v2304_v1, %s2215_s10 }
  0x53   : > { %1612 = vrot.lane.b32.xlu1 %v238_v3, %s2216_s11 }
  0x55   : > { %1610 = vrot.lane.b32.xlu0 %v2309_v2, %s2216_s11 }
  0x57   : > { %1608 = vrot.lane.b32.xlu1 %v2304_v1, %s2216_s11 }
  0x59   : > { %1614 = vrot.lane.b32.xlu0 %v244_v4, %s2216_s11 }
  0x5d   : > { %1776 = vperm.xlu0 %2124, %v1773_v6  }
  0x8d   : > { %v246_v7 = vpop.permute.xlu1 %245 }
  0x8f   : > { %v248_v8 = vpop.permute.xlu0 %247 }
  0x90   : > { %v254_v14 = vsel %vm253_vm1, %v246_v7, %v248_v8  ;;  %v1967_v7 = vld [vmem:[%s2513_s1 + $0x40] sm:$0xff] }
  0x91   : > { %v571_v9 = vpop.permute.xlu1 %570 }
  0x93   : > { %v250_v10 = vpop.permute.xlu0 %249 }
  0x94   : > { %v255_v11 = vsel %vm253_vm1, %v248_v8, %v250_v10 }
  0x95   : > { %v573_v13 = vpop.permute.xlu1 %572  ;;  %1921 = vmatprep.subr.msk.mxu0 %vm261_vm2, %v255_v11 }
  0x96   : > { %1922 = vmatpush1.msk.msra.mxu0 %vm261_vm2, %v254_v14  ;;  %v579_v20 = vsel %vm578_vm4, %v571_v9, %v573_v13 }
  0x97   : > { %1923 = vmatmul.mubr.msk.f32.vlgmr.msra.gmra.mrb[0].mxu0 %vm257_vm3, %v1920_v12  ;;  %v575_v15 = vpop.permute.xlu0 %574  ;;  %1926 = vmatprep.subr.msk.mxu0 %vm261_vm2, %v2309_v2 }
  0x98   : > { %v580_v16 = vsel %vm578_vm4, %v573_v13, %v575_v15  ;;  %1927 = vmatpush1.msk.msra.mxu0 %vm261_vm2, %v2304_v1  ;;  %485 = vmatprep.mubr.f32.mxu0 %v2207_v0 }
  0x99   : > { %v748_v17 = vpop.permute.xlu1 %747  ;;  %1932 = vmatprep.subr.msk.mxu0 %vm261_vm2, %v580_v16 }
  0x9b   : > { %v746_v18 = vpop.permute.xlu0 %745 }
  0x9c   : > { %v753_v22 = vsel %vm751_vm5, %v746_v18, %v748_v17 }
  0x9d   : > { %v252_v21 = vpop.permute.xlu1 %251 }
  0x9e   : > { %v256_v23 = vsel %vm253_vm1, %v250_v10, %v252_v21 }
  0x9f   : > { %1996 = vmatpush3.msk.msra.mxu1 %vm261_vm2, %v256_v23  ;;  %v744_v24 = vpop.permute.xlu0 %743  ;;  %1928 = vmatmul.mubr.msk.f32.vlgmr.msra.gmra.mrb[0].mxu0 %vm257_vm3, %v236_v19 }
  0xa0   : > { %1933 = vmatpush1.msk.msra.mxu0 %vm261_vm2, %v579_v20  ;;  %1998 = vmatmul.mubr.msk.f32.vlgmr.msra.gmra.mrb[0].mxu1 %vm257_vm3, %v1920_v12  ;;  %v752_v32 = vsel %vm751_vm5, %v744_v24, %v746_v18 }
  0xa1   : > { %1938 = vmatprep.subr.msk.mxu0 %vm261_vm2, %v753_v22  ;;  %v921_v26 = vpop.permute.xlu1 %920  ;;  %2000 = vmatprep.subr.mxu1 %v2207_v0 }
  0xa2   : > { %2001 = vmatpush3.msk.msra.mxu1 %vm261_vm2, %v235_v25  ;;  %2002 = vmatprep.mubr.msk.f32.mxu1 %vm2210_vm0, %v2207_v0 }
  0xa3   : > { %v919_v27 = vpop.permute.xlu0 %918  ;;  %655 = vmatprep.mubr.f32.mxu0 %v2207_v0  ;;  %2005 = vmatprep.subr.mxu1 %v2207_v0 }
  0xa4   : > { %2003 = vmatmul.mubr.msk.f32.vlgmr.msra.gmra.mrb[2].mxu1 %vm257_vm3, %v236_v19  ;;  %v926_v30 = vsel %vm924_vm6, %v919_v27, %v921_v26 }
  0xa5   : > { %v577_v29 = vpop.permute.xlu1 %576  ;;  %2007 = vmatprep.mubr.msk.f32.mxu1 %vm2210_vm0, %v2207_v0 }
  0xa6   : > { %v581_v31 = vsel %vm578_vm4, %v575_v15, %v577_v29 }
  0xa7   : > { %v917_v33 = vpop.permute.xlu0 %916  ;;  %1934 = vmatmul.mubr.msk.f32.vlgmr.msra.gmra.mrb[0].mxu0 %vm257_vm3, %v1931_v28  ;;  %2006 = vmatpush3.msk.msra.mxu1 %vm261_vm2, %v581_v31 }
  0xa8   : > { %1939 = vmatpush1.msk.msra.mxu0 %vm261_vm2, %v752_v32  ;;  %828 = vmatprep.mubr.f32.mxu0 %v2207_v0  ;;  %v925_v40 = vsel %vm924_vm6, %v917_v33, %v919_v27 }
  0xa9   : > { %1944 = vmatprep.subr.msk.mxu0 %vm261_vm2, %v926_v30  ;;  %v1094_v34 = vpop.permute.xlu1 %1093  ;;  %2010 = vmatprep.subr.mxu1 %v2207_v0 }
  0xaa   : > { %2008 = vmatmul.mubr.msk.f32.vlgmr.msra.gmra.mrb[4].mxu1 %vm257_vm3, %v1931_v28 }
  0xab   : > { %v1092_v35 = vpop.permute.xlu0 %1091  ;;  %2012 = vmatprep.mubr.msk.f32.mxu1 %vm2210_vm0, %v2207_v0 }
  0xac   : > { %v1099_v38 = vsel %vm1097_vm7, %v1092_v35, %v1094_v34 }
  0xad   : > { %v750_v37 = vpop.permute.xlu1 %749 }
  0xae   : > { %v754_v39 = vsel %vm751_vm5, %v748_v17, %v750_v37 }
  0xaf   : > { %v1090_v41 = vpop.permute.xlu0 %1089  ;;  %1940 = vmatmul.mubr.msk.f32.vlgmr.msra.gmra.mrb[0].mxu0 %vm257_vm3, %v1937_v36  ;;  %2011 = vmatpush3.msk.msra.mxu1 %vm261_vm2, %v754_v39 }
  0xb0   : > { %1945 = vmatpush1.msk.msra.mxu0 %vm261_vm2, %v925_v40  ;;  %2015 = vmatprep.subr.mxu1 %v2207_v0  ;;  %v1098_v47 = vsel %vm1097_vm7, %v1090_v41, %v1092_v35 }
  0xb1   : > { %1950 = vmatprep.subr.msk.mxu0 %vm261_vm2, %v1099_v38  ;;  %v1265_v42 = vpop.permute.xlu1 %1264  ;;  %2013 = vmatmul.mubr.msk.f32.vlgmr.msra.gmra.mrb[6].mxu1 %vm257_vm3, %v1937_v36 }
  0xb2   : > { %1001 = vmatprep.mubr.f32.mxu0 %v2207_v0  ;;  %2017 = vmatprep.mubr.msk.f32.mxu1 %vm2210_vm0, %v2207_v0 }
  0xb3   : > { %v923_v43 = vpop.permute.xlu0 %922 }
  0xb4   : > { %v927_v44 = vsel %vm924_vm6, %v921_v26, %v923_v43 }
  0xb5   : > { %2016 = vmatpush3.msk.msra.mxu1 %vm261_vm2, %v927_v44  ;;  %v1263_v46 = vpop.permute.xlu1 %1262 }
  0xb6   : > { %2018 = vmatmul.mubr.msk.f32.vlgmr.msra.gmra.mrb[8].mxu1 %vm257_vm3, %v1943_v45  ;;  %2020 = vmatprep.subr.mxu1 %v2207_v0  ;;  %v1271_v55 = vsel %vm1270_vm8, %v1263_v46, %v1265_v42 }
  0xb7   : > { %v1267_v48 = vpop.permute.xlu0 %1266  ;;  %1946 = vmatmul.mubr.msk.f32.vlgmr.msra.gmra.mrb[0].mxu0 %vm257_vm3, %v1943_v45  ;;  %2022 = vmatprep.mubr.msk.f32.mxu1 %vm2210_vm0, %v2207_v0 }
  0xb8   : > { %v1272_v49 = vsel %vm1270_vm8, %v1265_v42, %v1267_v48  ;;  %1951 = vmatpush1.msk.msra.mxu0 %vm261_vm2, %v1098_v47  ;;  %1174 = vmatprep.mubr.f32.mxu0 %v2207_v0 }
  0xb9   : > { %1956 = vmatprep.subr.msk.mxu0 %vm261_vm2, %v1272_v49  ;;  %v1269_v50 = vpop.permute.xlu1 %1268 }
  0xba   : > { %v1273_v53 = vsel %vm1270_vm8, %v1267_v48, %v1269_v50 }
  0xbb   : > { %v1096_v51 = vpop.permute.xlu0 %1095 }
  0xbc   : > { %v1100_v54 = vsel %vm1097_vm7, %v1094_v34, %v1096_v51 }
  0xbd   : > { %2021 = vmatpush3.msk.msra.mxu1 %vm261_vm2, %v1100_v54  ;;  %v1440_v56 = vpop.permute.xlu1 %1439 }
  0xbe   : > { %2023 = vmatmul.mubr.msk.f32.vlgmr.msra.gmra.mrb[10].mxu1 %vm257_vm3, %v1949_v52  ;;  %2025 = vmatprep.subr.mxu1 %v2207_v0 }
  0xbf   : > { %v1438_v57 = vpop.permute.xlu0 %1437  ;;  %1952 = vmatmul.mubr.msk.f32.vlgmr.msra.gmra.mrb[0].mxu0 %vm257_vm3, %v1949_v52  ;;  %2026 = vmatpush3.msk.msra.mxu1 %vm261_vm2, %v1273_v53 }
  0xc0   : > { %v1445_v59 = vsel %vm1443_vm9, %v1438_v57, %v1440_v56  ;;  %1957 = vmatpush1.msk.msra.mxu0 %vm261_vm2, %v1271_v55  ;;  %2027 = vmatprep.mubr.msk.f32.mxu1 %vm2210_vm0, %v2207_v0 }
  0xc1   : > { %v1442_v60 = vpop.permute.xlu1 %1441  ;;  %2030 = vmatprep.subr.mxu1 %v2207_v0  ;;  %1962 = vmatprep.subr.msk.mxu0 %vm261_vm2, %v1445_v59 }
  0xc2   : > { %v1446_v61 = vsel %vm1443_vm9, %v1440_v56, %v1442_v60  ;;  %2028 = vmatmul.mubr.msk.f32.vlgmr.msra.gmra.mrb[12].mxu1 %vm257_vm3, %v1955_v58  ;;  %1347 = vmatprep.mubr.f32.mxu0 %v2207_v0 }
  0xc3   : > { %v1436_v62 = vpop.permute.xlu0 %1435  ;;  %2031 = vmatpush3.msk.msra.mxu1 %vm261_vm2, %v1446_v61  ;;  %2032 = vmatprep.mubr.msk.f32.mxu1 %vm2210_vm0, %v2207_v0 }
  0xc4   : > { %2035 = vmatprep.subr.mxu1 %v2207_v0  ;;  %v1444_v1 = vsel %vm1443_vm9, %v1436_v62, %v1438_v57 }
  0xc5   : > { %v1613_v2 = vpop.permute.xlu1 %1612 }
  0xc6   : > { %2033 = vmatmul.mubr.msk.f32.vlgmr.msra.gmra.mrb[14].mxu1 %vm257_vm3, %v1961_v63 }
  0xc7   : > { %v1611_v3 = vpop.permute.xlu0 %1610  ;;  %1958 = vmatmul.mubr.msk.f32.vlgmr.msra.gmra.mrb[0].mxu0 %vm257_vm3, %v1955_v58  ;;  %2037 = vmatprep.mubr.msk.f32.mxu1 %vm2210_vm0, %v2207_v0 }
  0xc8   : > { %1963 = vmatpush1.msk.msra.mxu0 %vm261_vm2, %v1444_v1  ;;  %v1618_v4 = vsel %vm1616_vm10, %v1611_v3, %v1613_v2  ;;  %1520 = vmatprep.mubr.f32.mxu0 %v2207_v0 }
  0xc9   : > { %1968 = vmatprep.subr.msk.mxu0 %vm261_vm2, %v1618_v4  ;;  %v1609_v5 = vpop.permute.xlu1 %1608 }
  0xca   : > { %v1617_v9 = vsel %vm1616_vm10, %v1609_v5, %v1611_v3 }
  0xcb   : > { %v1615_v6 = vpop.permute.xlu0 %1614 }
  0xcc   : > { %v1619_v8 = vsel %vm1616_vm10, %v1613_v2, %v1615_v6 }
  0xcd   : > { %2036 = vmatpush3.msk.msra.mxu1 %vm261_vm2, %v1619_v8 }
  0xce   : > { %2038 = vmatmul.mubr.msk.f32.vlgmr.msra.gmra.mrb[16].mxu1 %vm257_vm3, %v1967_v7 }
  0xcf   : > { %1964 = vmatmul.mubr.msk.f32.vlgmr.msra.gmra.mrb[0].mxu0 %vm257_vm3, %v1961_v63 }
  0xd0   : > { %1969 = vmatpush1.msk.msra.mxu0 %vm261_vm2, %v1617_v9  ;;  %1693 = vmatprep.mubr.f32.mxu0 %v2207_v0 }
  0xd7   : > { %1970 = vmatmul.mubr.msk.f32.vlgmr.msra.gmra.mrb[0].mxu0 %vm257_vm3, %v1967_v7 }
  0xdc   : > { %v1777_v33 = vpop.permute.xlu0 %1776 }
 0x173   : > { %v405_v10 = vpop.f32.mrb[0].mxu1 }
 0x174   : > { %v1999_v11 = vpop.f32.mrb[1].mxu1 }
 0x177   : > { %v558_v12 = vpop.f32.mrb[2].mxu1 }
 0x178   : > { %v559_v13 = vadd.f32 %v558_v12, %v405_v10  ;;  %v2004_v14 = vpop.f32.mrb[3].mxu1 }
 0x17d   : > { %v728_v15 = vpop.f32.mrb[4].mxu1 }
 0x17e   : > { %v734_v16 = vadd.f32 %v728_v15, %v559_v13  ;;  %v2009_v17 = vpop.f32.mrb[5].mxu1 }
 0x184   : > { %v901_v18 = vpop.f32.mrb[6].mxu1 }
 0x185   : > { %v907_v19 = vadd.f32 %v901_v18, %v734_v16  ;;  %v2014_v20 = vpop.f32.mrb[7].mxu1 }
 0x189   : > { %v1074_v21 = vpop.f32.mrb[8].mxu1 }
 0x18a   : > { %v1080_v22 = vadd.f32 %v1074_v21, %v907_v19  ;;  %v2019_v23 = vpop.f32.mrb[9].mxu1 }
 0x191   : > { %v1247_v24 = vpop.f32.mrb[10].mxu1 }
 0x192   : > { %v1253_v25 = vadd.f32 %v1247_v24, %v1080_v22  ;;  %v2024_v0 = vpop.f32.mrb[11].mxu1 }
 0x195   : > { %v1420_v26 = vpop.f32.mrb[12].mxu1 }
 0x196   : > { %v1426_v27 = vadd.f32 %v1420_v26, %v1253_v25  ;;  %v2029_v28 = vpop.f32.mrb[13].mxu1 }
 0x199   : > { %v1593_v29 = vpop.f32.mrb[14].mxu1 }
 0x19a   : > { %v1599_v30 = vadd.f32 %v1593_v29, %v1426_v27  ;;  %v2034_v31 = vpop.f32.mrb[15].mxu1 }
 0x1a1   : > { %v1766_v32 = vpop.f32.mrb[16].mxu1 }
 0x1a2   : > { %v1772_v34 = vadd.f32 %v1766_v32, %v1599_v30  ;;  %v2039_v35 = vpop.f32.mrb[17].mxu1 }
 0x1a4   : > { %v1781_v36 = vadd.f32 %v1777_v33, %v1772_v34 }
 0x1a6   : > { %1784 = vst [vmem:[%s215_s27 + $0x10] sm:$0xff] %v1781_v36 }
 0x1aa   : > { %v1695_v37 = vpop.f32.mrb[0].mxu0 }
 0x1ab   : > { %v1779_v38 = vadd.f32 %v1777_v33, %v1695_v37  ;;  %v1697_v39 = vpop.f32.mrb[1].mxu0 }
 0x1ac   : > { %v1780_v40 = vadd.f32 %v1777_v33, %v1697_v39 }
 0x1ad   : > { %1782 = vst [vmem:[%s215_s27] sm:$0xff] %v1779_v38 }
 0x1ae   : > { %1783 = vst [vmem:[%s215_s27 + $0x8] sm:$0xff] %v1780_v40 }
 0x1af   : > { %2140 = shalt.err (!%p2137_p5)
}
 0x1b0   : > { %s2141_s10 = scalar_lea.hbm %s2465_s5, 384  ;;  %s2145_s19 = scalar_lea.hbm %s2515_s3, 768 }
 0x1b1   : > { %p2142_p6 = scmp.ne.s32.totalorder %s2465_s5, %s2141_s10  ;;  %p2146_p10 = scmp.lt.u32.totalorder %s2465_s5, %s2515_s3 }
 0x1b2   : > { %p2147_p11 = scmp.lt.u32.totalorder %s2145_s19, %s2141_s10  ;;  %p2149_p13 = scmp.lt.u32.totalorder %s2141_s10, %s2465_s5 }
 0x1b3   : > { %p2143_p7 = pnand %p2142_p6, %p2279_p4 }
 0x1b4   : > { %p2148_p12 = por %p2147_p11, %p2146_p10 }
 0x1b5   : > { %p2144_p9 = pneg %p2143_p7 }
 0x1b6   : > { %p2150_p0 = por %p2149_p13, %p2148_p12 }
 0x1b8   : > { %p2151_p1 = pnand %p2150_p0, %p2144_p9 }
 0x1ba   : > { %2154 = shalt.err (!%p2151_p1)
}
 0x1bb   : > { %2058 = dma.vmem_to_hbm [thread:$0]  (%p2279_p4), %s2467_s29, 384, %s2465_s5, %s1786_s6  }
 0x1bc PF: > { %p2064_p2 = scmp.ge.s32.totalorder %s2205_s17, 2  ;;  %s1814_s26 = sand.u32 1, %s2185_s12  }
 0x1bd   : > { %s1815_s27 = scalar_lea.sflag [#allocation3], %s1814_s26 }
 0x1be   : > { %p2061_p3 = pnand %p2064_p2, %p2286_p8 }
 0x1c0   : > { %2180 = dma.done.wait (!%p2061_p3), %s1815_s27, 384  }
 0x1c1   : > { %2182 = vsyncadd (!%p2061_p3), %s1815_s27, 4294966912  ;;  %s16_s17 = sadd.s32 1, %s2205_s17   ;;  %s2518_s12 = smov %s2189_s13 }
 0x1c2   : > { %p13_p5 = scmp.ge.s32.totalorder %s16_s17, 4   ;;  %s2519_s13 = smov %s2193_s14 }
 0x1c3   : > { %s2520_s14 = smov %s2292_s25  ;;  %s2521_s15 = smov %s2201_s16 }
 0x1c4   : > { %s2522_s16 = smov %s2524_s20  ;;  %15 = sbr.rel (!%p13_p5) target bundleno = 4 (0x4), region = 81 }
 0x1cb   :  { %1820 = vsyncpa [#allocation3], 1 }
 0x1cc   :  { %1822 = vsyncpa [#allocation3 + $0x1], 1 }

</bundles_post_ra>
